<compile_context>
chip_gen: v7x
topology: tpu7x:2x2x1
jax: 0.10.0
libtpu: 0.0.40
codegen_flags: <defaults>
</compile_context>

<pallas_src>
import functools

import jax
import jax.numpy as jnp
from jax.experimental import pallas as pl
from jax.experimental.pallas import tpu as pltpu


def _gelu_exact(x):
    # Matches torch.nn.GELU() default (erf formulation), computed in f32.
    return 0.5 * x * (1.0 + jax.lax.erf(x * (1.0 / jnp.sqrt(2.0))))


def mlp_kernel(x_ref, w1_ref, b1_ref, w2_ref, b2_ref, o_ref, acc_ref):
    """One (row-tile, hidden-slab) step of out = gelu(x @ W1 + b1) @ W2 + b2.

    x_ref:  [tm, C]   bf16 VMEM (resident across the H axis)
    w1_ref: [C, th]   bf16 VMEM (hidden-column slab of W1)
    b1_ref: [1, th]   f32  VMEM
    w2_ref: [th, C]   bf16 VMEM (hidden-row slab of W2)
    b2_ref: [1, C]    f32  VMEM
    o_ref:  [tm, C]   VMEM output tile (written on the last H step)
    acc_ref:[tm, C]   f32  VMEM accumulator scratch
    """
    j = pl.program_id(1)

    @pl.when(j == 0)
    def _():
        acc_ref[...] = jnp.zeros_like(acc_ref)

    # c_fc slab: [tm, C] @ [C, th] -> [tm, th], bf16 operands, f32 accumulate.
    h = jnp.dot(x_ref[...], w1_ref[...], preferred_element_type=jnp.float32)
    h = h + b1_ref[...]

    # Activation (exact erf GELU, matches torch.nn.GELU() default) in f32.
    h = _gelu_exact(h)

    # mlp_dropout: nn.Dropout(0.1) in eval/inference mode is the identity.
    # TODO(synk): train-mode dropout would need pltpu.prng_seed/prng_random_bits;
    # torch's RNG stream cannot be reproduced bit-exactly.

    # c_proj partial sum: [tm, th] @ [th, C] accumulated into f32 scratch.
    acc_ref[...] += jnp.dot(h.astype(w2_ref.dtype), w2_ref[...],
                            preferred_element_type=jnp.float32)

    @pl.when(j == pl.num_programs(1) - 1)
    def _():
        o_ref[...] = (acc_ref[...] + b2_ref[...]).astype(o_ref.dtype)


def _pick_block_m():
    """Row tile: 128 on v5e (4x128^2 MXU), 256 on v6e/v7x (2x256^2 MXU)."""
    try:
        kind = jax.devices()[0].device_kind.lower()
    except Exception:  # pragma: no cover - defensive
        kind = ""
    if "v5 lite" in kind or "v5e" in kind or "v5lite" in kind:
        return 128
    return 256


@functools.partial(jax.jit, static_argnames=("block_m", "block_h"))
def _mlp_forward(x, w1, b1, w2, b2, *, block_m, block_h):
    B, T, C = x.shape
    H = w1.shape[1]
    M = B * T
    out_dtype = x.dtype
    cdt = jnp.bfloat16

    # Cast once in the wrapper: bf16 operands halve HBM/VMEM traffic and run
    # the MXU at full bf16 rate.  Biases stay f32 (added to the f32 accum).
    x2d = x.reshape(M, C).astype(cdt)
    w1c = w1.astype(cdt)
    w2c = w2.astype(cdt)
    b1_2d = b1.reshape(1, H).astype(jnp.float32)
    b2_2d = b2.reshape(1, C).astype(jnp.float32)

    tm = min(block_m, M)
    th = block_h if (H % block_h == 0) else H     # th is a multiple of 128 or full H
    grid = (pl.cdiv(M, tm), H // th)

    out_itemsize = jnp.dtype(out_dtype).itemsize
    cost = pl.CostEstimate(
        flops=4 * M * C * H,            # two matmuls: 2*M*C*H each
        transcendentals=M * H,          # erf per hidden activation
        bytes_accessed=(2 * (M * C + C * H + H * C)   # bf16 x, W1, W2
                        + 4 * (H + C)                 # f32 biases
                        + out_itemsize * M * C),      # output
    )

    out2d = pl.pallas_call(
        mlp_kernel,
        out_shape=jax.ShapeDtypeStruct((M, C), out_dtype),
        grid_spec=pltpu.PrefetchScalarGridSpec(
            num_scalar_prefetch=0,
            grid=grid,
            in_specs=[
                pl.BlockSpec((tm, C), lambda i, j: (i, 0)),   # x rows (resident over j)
                pl.BlockSpec((C, th), lambda i, j: (0, j)),   # W1 column slab
                pl.BlockSpec((1, th), lambda i, j: (0, j)),   # b1 slab
                pl.BlockSpec((th, C), lambda i, j: (j, 0)),   # W2 row slab
                pl.BlockSpec((1, C), lambda i, j: (0, 0)),    # b2 (constant, tiny)
            ],
            out_specs=pl.BlockSpec((tm, C), lambda i, j: (i, 0)),
            scratch_shapes=[pltpu.VMEM((tm, C), jnp.float32)],  # f32 accumulator
        ),
        compiler_params=pltpu.CompilerParams(
            dimension_semantics=("parallel", "arbitrary")),
        cost_estimate=cost,
    )(x2d, w1c, b1_2d, w2c, b2_2d)

    return out2d.reshape(B, T, C)


def mlp_forward(x, w1, b1, w2, b2, *, block_m=None, block_h=512):
    """x: [B, T, C]; w1: [C, 4C]; b1: [4C]; w2: [4C, C]; b2: [C]. Eval mode."""
    if block_m is None:
        block_m = _pick_block_m()
    return _mlp_forward(x, w1, b1, w2, b2, block_m=block_m, block_h=block_h)


def mlp_reference(x, w1, b1, w2, b2):
    # Pure-f32 reference path (HIGHEST precision matmuls).
    hp = jax.lax.Precision.HIGHEST
    h = jnp.dot(x, w1, precision=hp) + b1
    h = _gelu_exact(h)
    return jnp.dot(h, w2, precision=hp) + b2


if __name__ == "__main__":
    # Small GPT-2-style shapes: batch=2, seq=8, n_embd=128 -> hidden=512.
    B, T, C = 2, 8, 128
    H = 4 * C

    key = jax.random.PRNGKey(0)
    kx, kw1, kb1, kw2, kb2 = jax.random.split(key, 5)

    x = jax.random.normal(kx, (B, T, C), dtype=jnp.float32)

    # Deterministic init mimicking torch.nn.Linear default U(-1/sqrt(fan_in), +...).
    lim1 = 1.0 / jnp.sqrt(C)
    lim2 = 1.0 / jnp.sqrt(H)
    w1 = jax.random.uniform(kw1, (C, H), jnp.float32, -lim1, lim1)   # c_fc weight^T
    b1 = jax.random.uniform(kb1, (H,), jnp.float32, -lim1, lim1)     # c_fc bias
    w2 = jax.random.uniform(kw2, (H, C), jnp.float32, -lim2, lim2)   # c_proj weight^T
    b2 = jax.random.uniform(kb2, (C,), jnp.float32, -lim2, lim2)     # c_proj bias

    out = jax.block_until_ready(mlp_forward(x, w1, b1, w2, b2))

    ref = mlp_reference(x, w1, b1, w2, b2)
    assert out.shape == (B, T, C)
    # bf16 operands with f32 accumulation vs. pure-f32 reference -> loose tol.
    assert jnp.allclose(out.astype(jnp.float32), ref, atol=2e-2, rtol=2e-2), \
        "mismatch vs f32 reference"

    print("KERNEL_OK")
</pallas_src>

<mosaic_0001>
module attributes {stable_mosaic.version = 11 : i64} {
  func.func @mlp_kernel(%arg0: i32, %arg1: i32, %arg2: memref<16x128xbf16, #tpu.memory_space<vmem>>, %arg3: memref<128x512xbf16, #tpu.memory_space<vmem>>, %arg4: memref<1x512xf32, #tpu.memory_space<vmem>>, %arg5: memref<512x128xbf16, #tpu.memory_space<vmem>>, %arg6: memref<1x128xf32, #tpu.memory_space<vmem>>, %arg7: memref<16x128xf32, #tpu.memory_space<vmem>>, %arg8: memref<16x128xf32, #tpu.memory_space<vmem>>) attributes {dimension_semantics = [#tpu.dimension_semantics<parallel>, #tpu.dimension_semantics<arbitrary>], iteration_bounds = array<i64: 1, 1>, scalar_prefetch = 0 : i64, scratch_operands = 1 : i64, tpu.core_type = #tpu.core_type<tc>, window_params = [{transform_indices = @transform_0, window_bounds = array<i64: 16, 128>}, {transform_indices = @transform_1, window_bounds = array<i64: 128, 512>}, {transform_indices = @transform_2, window_bounds = array<i64: 1, 512>}, {transform_indices = @transform_3, window_bounds = array<i64: 512, 128>}, {pipeline_mode = #tpu.pipeline_mode<synchronous>, transform_indices = @transform_4, window_bounds = array<i64: 1, 128>}, {transform_indices = @transform_5, window_bounds = array<i64: 16, 128>}]} {
    %c0_i32 = arith.constant 0 : i32
    %0 = arith.cmpi eq, %arg1, %c0_i32 : i32
    %1 = arith.extui %0 : i1 to i32
    %c0_i32_0 = arith.constant 0 : i32
    %2 = arith.cmpi ne, %1, %c0_i32_0 : i32
    scf.if %2 {
      %cst_19 = arith.constant 0.000000e+00 : f32
      %28 = vector.broadcast %cst_19 : f32 to vector<16x128xf32>
      %c0_20 = arith.constant 0 : index
      %c0_21 = arith.constant 0 : index
      %29 = vector.load %arg8[%c0_20, %c0_21] : memref<16x128xf32, #tpu.memory_space<vmem>>, vector<16x128xf32>
      tpu.vector_store %arg8[%c0_20, %c0_21], %28 {strides = array<i32>} : memref<16x128xf32, #tpu.memory_space<vmem>>, vector<16x128xf32>,
    } else {
    }
    %c0 = arith.constant 0 : index
    %c0_1 = arith.constant 0 : index
    %3 = vector.load %arg2[%c0, %c0_1] : memref<16x128xbf16, #tpu.memory_space<vmem>>, vector<16x128xbf16>
    %c0_2 = arith.constant 0 : index
    %c0_3 = arith.constant 0 : index
    %4 = vector.load %arg3[%c0_2, %c0_3] : memref<128x512xbf16, #tpu.memory_space<vmem>>, vector<128x512xbf16>
    %cst = arith.constant dense<0.000000e+00> : vector<16x512xf32>
    %5 = tpu.matmul %3, %4, %cst {dimension_numbers = #tpu.dot_dimension_numbers<[1], [0], [0], [1], [0, 0, 1, 1], [], []>} : vector<16x128xbf16>, vector<128x512xbf16>, vector<16x512xf32> -> vector<16x512xf32>
    %c0_4 = arith.constant 0 : index
    %c0_5 = arith.constant 0 : index
    %6 = vector.load %arg4[%c0_4, %c0_5] : memref<1x512xf32, #tpu.memory_space<vmem>>, vector<1x512xf32>
    %7 = vector.broadcast %6 : vector<1x512xf32> to vector<16x512xf32>
    %8 = arith.addf %5, %7 : vector<16x512xf32>
    %cst_6 = arith.constant 5.000000e-01 : f32
    %9 = vector.broadcast %cst_6 : f32 to vector<16x512xf32>
    %10 = arith.mulf %9, %8 : vector<16x512xf32>
    %cst_7 = arith.constant 2.000000e+00 : f32
    %11 = math.sqrt %cst_7 : f32
    %cst_8 = arith.constant 1.000000e+00 : f32
    %12 = arith.divf %cst_8, %11 : f32
    %13 = vector.broadcast %12 : f32 to vector<16x512xf32>
    %14 = arith.mulf %8, %13 : vector<16x512xf32>
    %15 = math.erf %14 : vector<16x512xf32>
    %cst_9 = arith.constant 1.000000e+00 : f32
    %16 = vector.broadcast %cst_9 : f32 to vector<16x512xf32>
    %17 = arith.addf %16, %15 : vector<16x512xf32>
    %18 = arith.mulf %10, %17 : vector<16x512xf32>
    %c0_10 = arith.constant 0 : index
    %c0_11 = arith.constant 0 : index
    %19 = vector.load %arg8[%c0_10, %c0_11] : memref<16x128xf32, #tpu.memory_space<vmem>>, vector<16x128xf32>
    %20 = arith.truncf %18 : vector<16x512xf32> to vector<16x512xbf16>
    %c0_12 = arith.constant 0 : index
    %c0_13 = arith.constant 0 : index
    %21 = vector.load %arg5[%c0_12, %c0_13] : memref<512x128xbf16, #tpu.memory_space<vmem>>, vector<512x128xbf16>
    %cst_14 = arith.constant dense<0.000000e+00> : vector<16x128xf32>
    %22 = tpu.matmul %20, %21, %cst_14 {dimension_numbers = #tpu.dot_dimension_numbers<[1], [0], [0], [1], [0, 0, 1, 1], [], []>} : vector<16x512xbf16>, vector<512x128xbf16>, vector<16x128xf32> -> vector<16x128xf32>
    %23 = arith.addf %19, %22 : vector<16x128xf32>
    %c0_15 = arith.constant 0 : index
    %c0_16 = arith.constant 0 : index
    %24 = vector.load %arg8[%c0_15, %c0_16] : memref<16x128xf32, #tpu.memory_space<vmem>>, vector<16x128xf32>
    tpu.vector_store %arg8[%c0_15, %c0_16], %23 {strides = array<i32>} : memref<16x128xf32, #tpu.memory_space<vmem>>, vector<16x128xf32>,
    %c0_i32_17 = arith.constant 0 : i32
    %25 = arith.cmpi eq, %arg1, %c0_i32_17 : i32
    %26 = arith.extui %25 : i1 to i32
    %c0_i32_18 = arith.constant 0 : i32
    %27 = arith.cmpi ne, %26, %c0_i32_18 : i32
    scf.if %27 {
      %c0_19 = arith.constant 0 : index
      %c0_20 = arith.constant 0 : index
      %28 = vector.load %arg8[%c0_19, %c0_20] : memref<16x128xf32, #tpu.memory_space<vmem>>, vector<16x128xf32>
      %c0_21 = arith.constant 0 : index
      %c0_22 = arith.constant 0 : index
      %29 = vector.load %arg6[%c0_21, %c0_22] : memref<1x128xf32, #tpu.memory_space<vmem>>, vector<1x128xf32>
      %30 = vector.broadcast %29 : vector<1x128xf32> to vector<16x128xf32>
      %31 = arith.addf %28, %30 : vector<16x128xf32>
      %c0_23 = arith.constant 0 : index
      %c0_24 = arith.constant 0 : index
      %32 = vector.load %arg7[%c0_23, %c0_24] : memref<16x128xf32, #tpu.memory_space<vmem>>, vector<16x128xf32>
      tpu.vector_store %arg7[%c0_23, %c0_24], %31 {strides = array<i32>} : memref<16x128xf32, #tpu.memory_space<vmem>>, vector<16x128xf32>,
    } else {
    }
    return
  }
  func.func @transform_0(%arg0: i32, %arg1: i32) -> (i32, i32) {
    %c0_i32 = arith.constant 0 : i32
    %c0_i32_0 = arith.constant 0 : i32
    return %arg0, %c0_i32 : i32, i32
  }
  func.func @transform_1(%arg0: i32, %arg1: i32) -> (i32, i32) {
    %c0_i32 = arith.constant 0 : i32
    %c0_i32_0 = arith.constant 0 : i32
    return %c0_i32, %arg1 : i32, i32
  }
  func.func @transform_2(%arg0: i32, %arg1: i32) -> (i32, i32) {
    %c0_i32 = arith.constant 0 : i32
    %c0_i32_0 = arith.constant 0 : i32
    return %c0_i32, %arg1 : i32, i32
  }
  func.func @transform_3(%arg0: i32, %arg1: i32) -> (i32, i32) {
    %c0_i32 = arith.constant 0 : i32
    %c0_i32_0 = arith.constant 0 : i32
    return %arg1, %c0_i32 : i32, i32
  }
  func.func @transform_4(%arg0: i32, %arg1: i32) -> (i32, i32) {
    %c0_i32 = arith.constant 0 : i32
    %c0_i32_0 = arith.constant 0 : i32
    %c0_i32_1 = arith.constant 0 : i32
    return %c0_i32, %c0_i32_0 : i32, i32
  }
  func.func @transform_5(%arg0: i32, %arg1: i32) -> (i32, i32) {
    %c0_i32 = arith.constant 0 : i32
    %c0_i32_0 = arith.constant 0 : i32
    return %arg0, %c0_i32 : i32, i32
  }
}

</mosaic_0001>

<bundles_post_ra>
// kernel: _mlp_forward.1
= control target key start
LH: loop header
LB: loop body
LE: loop exit
PB: predicated region body
PF: predicated region fallthrough
CT: control target
= control target key end

     0   :  { %v991_v2 = vmov 0   ;;  %s1238_s0 = inlined_call_operand.vmem [shape: bf16[16,128], index: 0, kind: input, shape index: {}]   ;;  %s1239_s1 = inlined_call_operand.vmem [shape: bf16[128,512], index: 1, kind: input, shape index: {}]   ;;  %s1240_s2 = inlined_call_operand.vmem [shape: f32[1,512], index: 2, kind: input, shape index: {}]   ;;  %s1241_s3 = inlined_call_operand.vmem [shape: bf16[512,128], index: 3, kind: input, shape index: {}]   ;;  %s1242_s4 = inlined_call_operand.vmem [shape: f32[1,128], index: 4, kind: input, shape index: {}]   ;;  %s1243_s5 = inlined_call_operand.hbm [shape: f32[16,128], index: 5, kind: output, shape index: {}]  }
   0x1   :  { %v870_v0 = vld [vmem:[%s1239_s1 + $0x4] ss:$16 sps:$4 sm:$0xff]   ;;  %v872_v1 = vld [vmem:[%s1239_s1 + $0xc] ss:$16 sps:$4 sm:$0xff]   ;;  %282 = vmatprep.mubr.bf16.mxu0 %v991_v2  ;;  %325 = vmatprep.mubr.bf16.mxu1 %v991_v2  ;;  %v874_v3 = vld [vmem:[%s1239_s1] ss:$16 sps:$4 sm:$0xff]  }
   0x2   :  { %250 = vmatprep.subr.bf16.mxu0 %v870_v0  ;;  %v875_v4 = vld [vmem:[%s1239_s1 + $0x8] ss:$16 sps:$4 sm:$0xff]   ;;  %293 = vmatprep.subr.bf16.mxu1 %v872_v1  ;;  %v876_v5 = vld [vmem:[%s1239_s1 + $0x24] ss:$16 sps:$4 sm:$0xff]   ;;  %v878_v6 = vld [vmem:[%s1239_s1 + $0x2c] ss:$16 sps:$4 sm:$0xff]  }
   0x3   :  { %251 = vmatpush1.bf16.msra.mxu0 %v874_v3  ;;  %294 = vmatpush1.bf16.msra.mxu1 %v875_v4  ;;  %v880_v7 = vld [vmem:[%s1239_s1 + $0x20] ss:$16 sps:$4 sm:$0xff]   ;;  %v881_v8 = vld [vmem:[%s1239_s1 + $0x28] ss:$16 sps:$4 sm:$0xff]   ;;  %v882_v9 = vld [vmem:[%s1239_s1 + $0x44] ss:$16 sps:$4 sm:$0xff]  }
   0x4   :  { %252 = vmatprep.subr.bf16.mxu0 %v876_v5  ;;  %295 = vmatprep.subr.bf16.mxu1 %v878_v6  ;;  %v884_v10 = vld [vmem:[%s1239_s1 + $0x4c] ss:$16 sps:$4 sm:$0xff]   ;;  %v886_v11 = vld [vmem:[%s1239_s1 + $0x40] ss:$16 sps:$4 sm:$0xff]   ;;  %v887_v12 = vld [vmem:[%s1239_s1 + $0x48] ss:$16 sps:$4 sm:$0xff]  }
   0x5   :  { %v888_v13 = vld [vmem:[%s1239_s1 + $0x64] ss:$16 sps:$4 sm:$0xff]   ;;  %v890_v14 = vld [vmem:[%s1239_s1 + $0x6c] ss:$16 sps:$4 sm:$0xff]   ;;  %v892_v15 = vld [vmem:[%s1239_s1 + $0x60] ss:$16 sps:$4 sm:$0xff]  }
   0x6   :  { %v893_v16 = vld [vmem:[%s1239_s1 + $0x68] ss:$16 sps:$4 sm:$0xff]   ;;  %v894_v17 = vld [vmem:[%s1239_s1 + $0x84] ss:$16 sps:$4 sm:$0xff]   ;;  %v896_v18 = vld [vmem:[%s1239_s1 + $0x8c] ss:$16 sps:$4 sm:$0xff]  }
   0x7   :  { %253 = vmatpush1.bf16.msra.mxu0 %v880_v7  ;;  %296 = vmatpush1.bf16.msra.mxu1 %v881_v8  ;;  %v898_v19 = vld [vmem:[%s1239_s1 + $0x80] ss:$16 sps:$4 sm:$0xff]   ;;  %v899_v20 = vld [vmem:[%s1239_s1 + $0x88] ss:$16 sps:$4 sm:$0xff]   ;;  %v900_v21 = vld [vmem:[%s1239_s1 + $0xa4] ss:$16 sps:$4 sm:$0xff]  }
   0x8   :  { %254 = vmatprep.subr.bf16.mxu0 %v882_v9  ;;  %297 = vmatprep.subr.bf16.mxu1 %v884_v10  ;;  %v902_v22 = vld [vmem:[%s1239_s1 + $0xac] ss:$16 sps:$4 sm:$0xff]   ;;  %v904_v23 = vld [vmem:[%s1239_s1 + $0xa0] ss:$16 sps:$4 sm:$0xff]   ;;  %v905_v24 = vld [vmem:[%s1239_s1 + $0xa8] ss:$16 sps:$4 sm:$0xff]  }
   0x9   :  { %v906_v25 = vld [vmem:[%s1239_s1 + $0xc4] ss:$16 sps:$4 sm:$0xff]   ;;  %v908_v26 = vld [vmem:[%s1239_s1 + $0xcc] ss:$16 sps:$4 sm:$0xff]   ;;  %v910_v27 = vld [vmem:[%s1239_s1 + $0xc0] ss:$16 sps:$4 sm:$0xff]  }
   0xa   :  { %v911_v28 = vld [vmem:[%s1239_s1 + $0xc8] ss:$16 sps:$4 sm:$0xff]   ;;  %v912_v29 = vld [vmem:[%s1239_s1 + $0xe4] ss:$16 sps:$4 sm:$0xff]   ;;  %v914_v30 = vld [vmem:[%s1239_s1 + $0xec] ss:$16 sps:$4 sm:$0xff]  }
   0xb   :  { %255 = vmatpush1.bf16.msra.mxu0 %v886_v11  ;;  %298 = vmatpush1.bf16.msra.mxu1 %v887_v12  ;;  %v916_v31 = vld [vmem:[%s1239_s1 + $0xe0] ss:$16 sps:$4 sm:$0xff]   ;;  %v917_v32 = vld [vmem:[%s1239_s1 + $0xe8] ss:$16 sps:$4 sm:$0xff]  }
   0xc   :  { %256 = vmatprep.subr.bf16.mxu0 %v888_v13  ;;  %299 = vmatprep.subr.bf16.mxu1 %v890_v14  ;;  %v919_v33 = vld [vmem:[%s1241_s3 + $0x40] sm:$0xff]   ;;  %v923_v38 = vld [vmem:[%s1241_s3 + $0x48] sm:$0xff]  }
   0xd   :  { %v918_v34 = vld [vmem:[%s1238_s0] sm:$0xff]   ;;  %v924_v39 = vld [vmem:[%s1241_s3 + $0xc8] sm:$0xff]  }
   0xe   :  { %v920_v35 = vld [vmem:[%s1241_s3 + $0xc0] sm:$0xff]   ;;  %v925_v40 = vld [vmem:[%s1241_s3 + $0x8] sm:$0xff]  }
   0xf   :  { %257 = vmatpush1.bf16.msra.mxu0 %v892_v15  ;;  %300 = vmatpush1.bf16.msra.mxu1 %v893_v16  ;;  %v921_v36 = vld [vmem:[%s1241_s3] sm:$0xff]   ;;  %v926_v41 = vld [vmem:[%s1241_s3 + $0x88] sm:$0xff]  }
  0x10   :  { %258 = vmatprep.subr.bf16.mxu0 %v894_v17  ;;  %301 = vmatprep.subr.bf16.mxu1 %v896_v18  ;;  %v922_v37 = vld [vmem:[%s1241_s3 + $0x80] sm:$0xff]  }
  0x13   :  { %259 = vmatpush1.bf16.msra.mxu0 %v898_v19  ;;  %302 = vmatpush1.bf16.msra.mxu1 %v899_v20 }
  0x14   :  { %260 = vmatprep.subr.bf16.mxu0 %v900_v21  ;;  %303 = vmatprep.subr.bf16.mxu1 %v902_v22 }
  0x17   :  { %261 = vmatpush1.bf16.msra.mxu0 %v904_v23  ;;  %304 = vmatpush1.bf16.msra.mxu1 %v905_v24 }
  0x18   :  { %262 = vmatprep.subr.bf16.mxu0 %v906_v25  ;;  %305 = vmatprep.subr.bf16.mxu1 %v908_v26 }
  0x1b   :  { %263 = vmatpush1.bf16.msra.mxu0 %v910_v27  ;;  %306 = vmatpush1.bf16.msra.mxu1 %v911_v28 }
  0x1c   :  { %264 = vmatprep.subr.bf16.mxu0 %v912_v29  ;;  %307 = vmatprep.subr.bf16.mxu1 %v914_v30 }
  0x1f   :  { %265 = vmatpush1.bf16.msra.mxu0 %v916_v31  ;;  %308 = vmatpush1.bf16.msra.mxu1 %v917_v32 }
  0x20   :  { %822 = vmatprep.subr.bf16.mxu0 %v919_v33  ;;  %844 = vmatprep.subr.bf16.mxu1 %v920_v35 }
  0x22   :  { %283 = vmatmul.mubr.bf16.vlgmr.msra.gmra.mrb[0].mxu0 %v918_v34  ;;  %326 = vmatmul.mubr.bf16.vlgmr.msra.gmra.mrb[0].mxu1 %v918_v34 }
  0x23   :  { %823 = vmatpush3.bf16.msra.mxu0 %v921_v36  ;;  %845 = vmatpush3.bf16.msra.mxu1 %v922_v37 }
  0x24   :  { %824 = vmatprep.subr.bf16.mxu0 %v923_v38  ;;  %846 = vmatprep.subr.bf16.mxu1 %v924_v39 }
  0x27   :  { %825 = vmatpush3.bf16.msra.mxu0 %v925_v40  ;;  %847 = vmatpush3.bf16.msra.mxu1 %v926_v41 }
  0x28   :  { %10 = vsyncpa [#allocation4], 0  ;;  %v927_v42 = vld [vmem:[%s1241_s3 + $0x50] sm:$0xff]   ;;  %v931_v46 = vld [vmem:[%s1241_s3 + $0x58] sm:$0xff]   ;;  %v64_v2 = vlaneseq  ;;  %s992_s0 = smov [#allocation3]  }
  0x29   :  { %v928_v43 = vld [vmem:[%s1241_s3 + $0xd0] sm:$0xff]   ;;  %826 = vmatprep.subr.bf16.mxu0 %v927_v42  ;;  %v932_v47 = vld [vmem:[%s1241_s3 + $0xd8] sm:$0xff]   ;;  %v935_v50 = vld [vmem:[%s1241_s3 + $0x60] sm:$0xff]   ;;  %s745_s20 = sshll.u32 %s992_s0, 4  ;;  %s746_s20 = int_to_ptr.vmem [resolvable:$true] %s745_s20 }
  0x2a   :  { %848 = vmatprep.subr.bf16.mxu1 %v928_v43  ;;  %v929_v44 = vld [vmem:[%s1241_s3 + $0x10] sm:$0xff]   ;;  %v933_v48 = vld [vmem:[%s1241_s3 + $0x18] sm:$0xff]   ;;  %v936_v51 = vld [vmem:[%s1241_s3 + $0xe0] sm:$0xff]   ;;  %v65_v3 = vshrl.u32 %v64_v2, 7  ;;  %s967_s21 = scalar_lea.vmem %s746_s20, 256  ;;  %p972_p1 = scmp.lt.s32.totalorder %s746_s20, %s746_s20 }
  0x2b   :  { %v930_v45 = vld [vmem:[%s1241_s3 + $0x90] sm:$0xff]   ;;  %827 = vmatpush3.bf16.msra.mxu0 %v929_v44  ;;  %v934_v49 = vld [vmem:[%s1241_s3 + $0x98] sm:$0xff]   ;;  %v937_v52 = vld [vmem:[%s1241_s3 + $0x20] sm:$0xff]   ;;  %p968_p0 = scmp.ne.s32.totalorder %s746_s20, %s967_s21  ;;  %p973_p2 = scmp.lt.s32.totalorder %s967_s21, %s967_s21 }
  0x2c   :  { %849 = vmatpush3.bf16.msra.mxu1 %v930_v45  ;;  %828 = vmatprep.subr.bf16.mxu0 %v931_v46  ;;  %v938_v53 = vld [vmem:[%s1241_s3 + $0xa0] sm:$0xff]   ;;  %v939_v54 = vld [vmem:[%s1241_s3 + $0x68] sm:$0xff]   ;;  %v943_v58 = vld [vmem:[%s1241_s3 + $0x70] sm:$0xff]   ;;  %v66_v4 = vsub.s32 0, %v65_v3  ;;  %v74_v5 = vsub.s32 2, %v65_v3  ;;  %v70_v7 = vsub.s32 1, %v65_v3 }
  0x2d   :  { %850 = vmatprep.subr.bf16.mxu1 %v932_v47  ;;  %v940_v55 = vld [vmem:[%s1241_s3 + $0xe8] sm:$0xff]   ;;  %v944_v59 = vld [vmem:[%s1241_s3 + $0xf0] sm:$0xff]   ;;  %v947_v62 = vld [vmem:[%s1241_s3 + $0x78] sm:$0xff]   ;;  %v78_v8 = vsub.s32 3, %v65_v3  ;;  %p974_p3 = por %p973_p2, %p972_p1 }
  0x2e   :  { %v941_v56 = vld [vmem:[%s1241_s3 + $0x28] sm:$0xff]   ;;  %v945_v60 = vld [vmem:[%s1241_s3 + $0x30] sm:$0xff]   ;;  %v948_v63 = vld [vmem:[%s1241_s3 + $0xf8] sm:$0xff]  }
  0x2f   :  { %829 = vmatpush3.bf16.msra.mxu0 %v933_v48  ;;  %v942_v57 = vld [vmem:[%s1241_s3 + $0xa8] sm:$0xff]   ;;  %v946_v61 = vld [vmem:[%s1241_s3 + $0xb0] sm:$0xff]   ;;  %v949_v0 = vld [vmem:[%s1241_s3 + $0x38] sm:$0xff]   ;;  %p975_p4 = pnand %p974_p3, %p968_p0 }
  0x30   :  { %851 = vmatpush3.bf16.msra.mxu1 %v934_v49  ;;  %830 = vmatprep.subr.bf16.mxu0 %v935_v50  ;;  %v950_v1 = vld [vmem:[%s1241_s3 + $0xb8] sm:$0xff]   ;;  %v62_v6 = vld [vmem:[%s1240_s2] sm:$0xf] }
  0x31   :  { %852 = vmatprep.subr.bf16.mxu1 %v936_v51  ;;  %v67_v9 = vrot.slane %v62_v6, %v66_v4  ;;  %v75_v10 = vrot.slane %v62_v6, %v74_v5  ;;  %v71_v11 = vrot.slane %v62_v6, %v70_v7  ;;  %v79_v12 = vrot.slane %v62_v6, %v78_v8 }
  0x33   :  { %831 = vmatpush3.bf16.msra.mxu0 %v937_v52 }
  0x34   :  { %853 = vmatpush3.bf16.msra.mxu1 %v938_v53  ;;  %832 = vmatprep.subr.bf16.mxu0 %v939_v54 }
  0x35   :  { %854 = vmatprep.subr.bf16.mxu1 %v940_v55 }
  0x37   :  { %833 = vmatpush3.bf16.msra.mxu0 %v941_v56 }
  0x38   :  { %855 = vmatpush3.bf16.msra.mxu1 %v942_v57  ;;  %834 = vmatprep.subr.bf16.mxu0 %v943_v58 }
  0x39   :  { %856 = vmatprep.subr.bf16.mxu1 %v944_v59 }
  0x3b   :  { %835 = vmatpush3.bf16.msra.mxu0 %v945_v60 }
  0x3c   :  { %857 = vmatpush3.bf16.msra.mxu1 %v946_v61  ;;  %836 = vmatprep.subr.bf16.mxu0 %v947_v62 }
  0x3d   :  { %858 = vmatprep.subr.bf16.mxu1 %v948_v63 }
  0x3f   :  { %837 = vmatpush3.bf16.msra.mxu0 %v949_v0 }
  0x40   :  { %859 = vmatpush3.bf16.msra.mxu1 %v950_v1 }
  0xf5   :  { %v284_v13 = vpop.f32.mrb[0].mxu0  ;;  %v327_v14 = vpop.f32.mrb[0].mxu1 }
  0xf6   :  { %v285_v15 = vadd.f32 %v284_v13, %v67_v9  ;;  %v328_v16 = vadd.f32 %v327_v14, %v75_v10  ;;  %v286_v17 = vpop.f32.mrb[1].mxu0  ;;  %v329_v18 = vpop.f32.mrb[1].mxu1 }
  0xf7   :  { %v287_v19 = vadd.f32 %v286_v17, %v71_v11  ;;  %v330_v20 = vadd.f32 %v329_v18, %v79_v12  ;;  %v288_v21 = vpop.f32.mrb[2].mxu0  ;;  %v331_v22 = vpop.f32.mrb[2].mxu1  ;;  %v821_v18 = vld [vmem:[%s1242_s4] ss:$0 sm:$0xff] }
  0xf8   :  { %v344_v23 = vmul.f32 0.70710677, %v285_v15  ;;  %v346_v24 = vmul.f32 0.70710677, %v328_v16  ;;  %v289_v27 = vadd.f32 %v288_v21, %v67_v9  ;;  %v332_v28 = vadd.f32 %v331_v22, %v75_v10  ;;  %v290_v29 = vpop.f32.mrb[3].mxu0  ;;  %v333_v30 = vpop.f32.mrb[3].mxu1 }
  0xf9   :  { %v345_v25 = vmul.f32 0.70710677, %v287_v19  ;;  %v347_v26 = vmul.f32 0.70710677, %v330_v20  ;;  %v291_v31 = vadd.f32 %v290_v29, %v71_v11  ;;  %v334_v32 = vadd.f32 %v333_v30, %v79_v12 }
  0xfa   :  { %951 = verf.f32 %v344_v23  ;;  %v348_v33 = vmul.f32 0.70710677, %v289_v27  ;;  %v350_v34 = vmul.f32 0.70710677, %v332_v28  ;;  %v336_v43 = vmul.f32 0.5, %v285_v15 }
  0xfb   :  { %953 = verf.f32 %v346_v24  ;;  %v349_v35 = vmul.f32 0.70710677, %v291_v31  ;;  %v351_v36 = vmul.f32 0.70710677, %v334_v32  ;;  %v338_v44 = vmul.f32 0.5, %v328_v16 }
  0xfc   :  { %955 = verf.f32 %v345_v25  ;;  %v337_v47 = vmul.f32 0.5, %v287_v19  ;;  %v340_v49 = vmul.f32 0.5, %v289_v27  ;;  %v339_v52 = vmul.f32 0.5, %v330_v20 }
  0xfd   :  { %957 = verf.f32 %v347_v26  ;;  %v342_v54 = vmul.f32 0.5, %v332_v28  ;;  %v341_v59 = vmul.f32 0.5, %v291_v31  ;;  %v343_v63 = vmul.f32 0.5, %v334_v32 }
  0xfe   :  { %959 = verf.f32 %v348_v33 }
  0xff   :  { %961 = verf.f32 %v350_v34 }
 0x100   :  { %963 = verf.f32 %v349_v35 }
 0x101   :  { %965 = verf.f32 %v351_v36 }
 0x104   :  { %v952_v37 = vpop.eup %951 }
 0x105   :  { %v954_v38 = vpop.eup %953  ;;  %v360_v41 = vadd.f32 1.0, %v952_v37 }
 0x106   :  { %v956_v39 = vpop.eup %955  ;;  %v362_v45 = vadd.f32 1.0, %v954_v38 }
 0x107   :  { %v958_v40 = vpop.eup %957  ;;  %v361_v48 = vadd.f32 1.0, %v956_v39  ;;  %v368_v57 = vmul.f32 %v360_v41, %v336_v43 }
 0x108   :  { %v960_v42 = vpop.eup %959  ;;  %v363_v53 = vadd.f32 1.0, %v958_v40  ;;  %v370_v61 = vmul.f32 %v362_v45, %v338_v44 }
 0x109   :  { %v962_v46 = vpop.eup %961  ;;  %v364_v50 = vadd.f32 1.0, %v960_v42  ;;  %v369_v1 = vmul.f32 %v361_v48, %v337_v47 }
 0x10a   :  { %v964_v51 = vpop.eup %963  ;;  %v366_v55 = vadd.f32 1.0, %v962_v46  ;;  %v371_v4 = vmul.f32 %v363_v53, %v339_v52 }
 0x10b   :  { %v966_v56 = vpop.eup %965  ;;  %v372_v58 = vmul.f32 %v364_v50, %v340_v49  ;;  %v365_v60 = vadd.f32 1.0, %v964_v51 }
 0x10c   :  { %v374_v62 = vmul.f32 %v366_v55, %v342_v54  ;;  %v367_v0 = vadd.f32 1.0, %v966_v56 }
 0x10d   :  { %v378_v2 = vpack.c.bf16 %v372_v58, %v368_v57  ;;  %v373_v3 = vmul.f32 %v365_v60, %v341_v59 }
 0x10e   :  { %v380_v5 = vpack.c.bf16 %v374_v62, %v370_v61  ;;  %v375_v6 = vmul.f32 %v367_v0, %v343_v63 }
 0x10f   :  { %v379_v7 = vpack.c.bf16 %v373_v3, %v369_v1 }
 0x110   :  { %v381_v8 = vpack.c.bf16 %v375_v6, %v371_v4 }
 0x111   :  { %670 = vmatprep.mubr.bf16.mxu0 %v379_v7 }
 0x112   :  { %711 = vmatprep.mubr.bf16.mxu1 %v381_v8  ;;  %671 = vmatmul.mubr.bf16.vlgmr.msra.gmra.mrb[4].mxu0 %v378_v2 }
 0x113   :  { %712 = vmatmul.mubr.bf16.vlgmr.msra.gmra.mrb[4].mxu1 %v380_v5 }
 0x1e5   :  { %v838_v9 = vpop.f32.mrb[4].mxu0 }
 0x1e6   :  { %v860_v10 = vpop.f32.mrb[4].mxu1  ;;  %v839_v11 = vpop.f32.mrb[5].mxu0 }
 0x1e7   :  { %v840_v12 = vadd.f32 %v839_v11, %v838_v9  ;;  %v861_v13 = vpop.f32.mrb[5].mxu1  ;;  %v841_v14 = vpop.f32.mrb[6].mxu0 }
 0x1e8   :  { %v862_v15 = vadd.f32 %v861_v13, %v860_v10  ;;  %v863_v16 = vpop.f32.mrb[6].mxu1  ;;  %v842_v17 = vpop.f32.mrb[7].mxu0 }
 0x1e9   :  { %v843_v19 = vadd.f32 %v842_v17, %v841_v14  ;;  %v864_v20 = vpop.f32.mrb[7].mxu1 }
 0x1ea   :  { %v714_v21 = vadd.f32 %v862_v15, %v840_v12  ;;  %v865_v22 = vadd.f32 %v864_v20, %v863_v16 }
 0x1ec   :  { %v736_v23 = vadd.f32 %v821_v18, %v714_v21  ;;  %v717_v24 = vadd.f32 %v865_v22, %v843_v19 }
 0x1ee   :  { %738 = vst [vmem:[#allocation3] sm:$0xff] %v736_v23  ;;  %v737_v25 = vadd.f32 %v821_v18, %v717_v24 }
 0x1f0   :  { %739 = vst [vmem:[#allocation3 + $0x8] sm:$0xff] %v737_v25 }
 0x1f1   :  { %978 = shalt.err (!%p975_p4)
}
 0x1f2   :  { %s979_s23 = scalar_lea.hbm %s1243_s5, 256 }
 0x1f3   :  { %p980_p5 = scmp.ne.s32.totalorder %s1243_s5, %s979_s23  ;;  %p983_p6 = scmp.lt.u32.totalorder %s979_s23, %s1243_s5 }
 0x1f5   :  { %p985_p7 = pnand %p983_p6, %p980_p5 }
 0x1f7   :  { %988 = shalt.err (!%p985_p7)
}
 0x1f8   :  { %s993_s28 = smov 128   ;;  %s994_s29 = smov 8  }
 0x1f9   :  { %751 = dma.vmem_to_hbm [thread:$0]  %s746_s20, 256, %s1243_s5, [#allocation4], %s993_s28, %s993_s28, %s994_s29  }
 0x1fa   :  { %989 = dma.done.wait [#allocation4], 256  }
 0x1fb   :  { %990 = vsyncadd [#allocation4], 4294967040 }
 0x1fc   :  { %755 = vsyncpa [#allocation4], 1 }

</bundles_post_ra>
